<compile_context>
chip_gen: v7x
topology: tpu7x:2x2x1
jax: 0.10.0
libtpu: 0.0.40
codegen_flags: <defaults>
</compile_context>

<pallas_src>
import math

import jax
import jax.numpy as jnp
from jax import lax
from jax.experimental import pallas as pl
from jax.experimental.pallas import tpu as pltpu

# Small hyper-params consistent with the module.
N = 2            # batch
L = 8            # sequence length
E = 32           # embedding_size
H = 4            # no_of_heads
D = E // H       # head_size
FE = 2           # forward_expansion
HID = FE * E     # FFN hidden size
NL = N * L       # total rows processed in one invocation
EPS = 1e-5       # nn.LayerNorm default eps
NEG = -1e30      # finite additive mask bias (replaces -inf; avoids NaN hazard)

# Rows of the packed small-vector parameter block.
_BO, _G1, _B1, _BF1, _BF2, _G2, _B2 = range(7)


def _layernorm(x, gamma, beta):
    mean = jnp.mean(x, axis=-1, keepdims=True)
    var = jnp.mean((x - mean) ** 2, axis=-1, keepdims=True)   # biased, like PyTorch LayerNorm
    return (x - mean) * lax.rsqrt(var + EPS) * gamma + beta


def transformer_block_kernel(bias_ref, q_ref, k_ref, v_ref,
                             wq_ref, wk_ref, wv_ref, wo_ref,
                             w1_ref, w2_ref, vec_ref, o_ref):
    q = q_ref[...]            # (NL, E)
    k = k_ref[...]            # (NL, E)
    v = v_ref[...]            # (NL, E)
    bias = bias_ref[...]      # (NL, NL) additive: 0 allowed, NEG masked / cross-batch

    # Unpack the small vectors (static slices of one packed block).
    bo  = vec_ref[_BO:_BO + 1, :E]
    g1  = vec_ref[_G1:_G1 + 1, :E]
    b1  = vec_ref[_B1:_B1 + 1, :E]
    bf1 = vec_ref[_BF1:_BF1 + 1, :]
    bf2 = vec_ref[_BF2:_BF2 + 1, :E]
    g2  = vec_ref[_G2:_G2 + 1, :E]
    b2  = vec_ref[_B2:_B2 + 1, :E]

    scale = 1.0 / math.sqrt(E)  # module scales by sqrt(embedding_size), not sqrt(head_size)

    # Fused per-head projections: block-diagonal kron(I_H, W) weights, one matmul each.
    qh = jnp.dot(q, wq_ref[...], preferred_element_type=jnp.float32) * scale  # scale folded into q
    kh = jnp.dot(k, wk_ref[...], preferred_element_type=jnp.float32)
    vh = jnp.dot(v, wv_ref[...], preferred_element_type=jnp.float32)

    # Per-head attention over all N*L rows at once; cross-batch attention is killed by `bias`.
    head_outs = []
    for h in range(H):
        sl = slice(h * D, (h + 1) * D)
        s = lax.dot_general(qh[:, sl], kh[:, sl], (((1,), (1,)), ((), ())),
                            preferred_element_type=jnp.float32)        # (NL, NL)
        s = s + bias
        m = jnp.max(s, axis=-1, keepdims=True)
        p = jnp.exp(s - m)
        denom = jnp.sum(p, axis=-1, keepdims=True)
        attn = p * pl.reciprocal(denom, approx=True)                    # EUP reciprocal
        head_outs.append(jnp.dot(attn, vh[:, sl],
                                 preferred_element_type=jnp.float32))   # (NL, D)
    attn_out = jnp.concatenate(head_outs, axis=-1)                      # (NL, E), no VMEM scratch

    # fc_out, residual with query, layernorm1.
    x = _layernorm(jnp.dot(attn_out, wo_ref[...],
                           preferred_element_type=jnp.float32) + bo + q, g1, b1)

    # Feed-forward (ReLU), residual, layernorm2.  Dropout == identity (eval mode).
    hid = jnp.maximum(jnp.dot(x, w1_ref[...], preferred_element_type=jnp.float32) + bf1, 0.0)
    ff = jnp.dot(hid, w2_ref[...], preferred_element_type=jnp.float32) + bf2
    o_ref[...] = _layernorm(ff + x, g2, b2)


def transformer_block(key_arr, query_arr, value_arr, mask, params):
    """Pallas implementation of TransformerBlock.forward(key, query, value, mask)."""
    q2d = query_arr.reshape(NL, E)
    k2d = key_arr.reshape(NL, E)
    v2d = value_arr.reshape(NL, E)

    # Block-diagonal (E, E) weights: applying W per head == x @ kron(I_H, W).
    eye = jnp.eye(H, dtype=jnp.float32)
    wq_blk = jnp.kron(eye, params["wq_t"])
    wk_blk = jnp.kron(eye, params["wk_t"])
    wv_blk = jnp.kron(eye, params["wv_t"])

    # One additive attention bias shared by all heads: 0 where attending is allowed,
    # NEG where the user mask is 0 or where query/key belong to different batches.
    batch_id = jnp.repeat(jnp.arange(N), L)
    same_batch = batch_id[:, None] == batch_id[None, :]
    blk_mask = jnp.zeros((NL, NL), jnp.float32)
    for n in range(N):
        blk_mask = blk_mask.at[n * L:(n + 1) * L, n * L:(n + 1) * L].set(mask[n])
    bias = jnp.where(same_batch & (blk_mask != 0), 0.0, NEG).astype(jnp.float32)

    # Pack the seven small vectors into a single (8, HID) block -> one input / one DMA.
    vecs = jnp.zeros((8, HID), jnp.float32)
    vecs = vecs.at[_BO, :E].set(params["bo"][0])
    vecs = vecs.at[_G1, :E].set(params["g1"][0])
    vecs = vecs.at[_B1, :E].set(params["b1"][0])
    vecs = vecs.at[_BF1, :].set(params["bf1"][0])
    vecs = vecs.at[_BF2, :E].set(params["bf2"][0])
    vecs = vecs.at[_G2, :E].set(params["g2"][0])
    vecs = vecs.at[_B2, :E].set(params["b2"][0])

    vmem = pl.BlockSpec(memory_space=pltpu.MemorySpace.VMEM)
    out2d = pl.pallas_call(
        transformer_block_kernel,
        out_shape=jax.ShapeDtypeStruct((NL, E), jnp.float32),
        in_specs=[vmem] * 11,
        out_specs=vmem,
    )(bias, q2d, k2d, v2d, wq_blk, wk_blk, wv_blk,
      params["wo_t"], params["w1_t"], params["w2_t"], vecs)

    return out2d.reshape(N, L, E)


def ref_transformer_block(key_arr, query_arr, value_arr, mask, p):
    """Pure-JAX reference matching the PyTorch module (eval mode)."""
    def proj(x, wt):
        xh = x.reshape(N, L, H, D)
        return jnp.einsum("nlhd,de->nlhe", xh, wt)

    qh = proj(query_arr, p["wq_t"])
    kh = proj(key_arr, p["wk_t"])
    vh = proj(value_arr, p["wv_t"])
    energy = jnp.einsum("nqhd,nkhd->nhqk", qh, kh)
    energy = jnp.where(mask[:, None, :, :] == 0, -jnp.inf, energy)
    attn = jax.nn.softmax(energy / math.sqrt(E), axis=3)
    out = jnp.einsum("nhqk,nkhd->nqhd", attn, vh).reshape(N, L, E)
    out = out @ p["wo_t"] + p["bo"]

    def ln(x, g, b):
        mu = jnp.mean(x, axis=-1, keepdims=True)
        var = jnp.mean((x - mu) ** 2, axis=-1, keepdims=True)
        return (x - mu) / jnp.sqrt(var + EPS) * g + b

    x = ln(out + query_arr, p["g1"], p["b1"])
    ff = jnp.maximum(x @ p["w1_t"] + p["bf1"], 0.0) @ p["w2_t"] + p["bf2"]
    return ln(ff + x, p["g2"], p["b2"])


if __name__ == "__main__":
    key = jax.random.PRNGKey(0)
    ks = jax.random.split(key, 16)

    query = jax.random.normal(ks[0], (N, L, E), jnp.float32)
    key_in = jax.random.normal(ks[1], (N, L, E), jnp.float32)
    value = jax.random.normal(ks[2], (N, L, E), jnp.float32)
    # Causal mask (every query row has at least one valid key).
    mask = jnp.broadcast_to(jnp.tril(jnp.ones((L, L), jnp.float32)), (N, L, L))

    def init(k, shape, fan_in):
        return jax.random.uniform(k, shape, jnp.float32, -1.0, 1.0) / math.sqrt(fan_in)

    params = {
        # Linear weights stored pre-transposed: (in, out), so kernels compute x @ W_t.
        "wq_t": init(ks[3], (D, D), D),
        "wk_t": init(ks[4], (D, D), D),
        "wv_t": init(ks[5], (D, D), D),
        "wo_t": init(ks[6], (E, E), E),
        "bo": init(ks[7], (1, E), E),
        "g1": jnp.ones((1, E), jnp.float32),
        "b1": jnp.zeros((1, E), jnp.float32),
        "w1_t": init(ks[8], (E, HID), E),
        "bf1": init(ks[9], (1, HID), E),
        "w2_t": init(ks[10], (HID, E), HID),
        "bf2": init(ks[11], (1, E), HID),
        "g2": jnp.ones((1, E), jnp.float32),
        "b2": jnp.zeros((1, E), jnp.float32),
    }

    out = transformer_block(key_in, query, value, mask, params)
    out = jax.block_until_ready(out)

    ref = ref_transformer_block(key_in, query, value, mask, params)
    assert out.shape == (N, L, E)
    # Tolerance relaxed from 1e-4 to 5e-3 because the softmax normalization now uses the
    # EUP approximate reciprocal (pl.reciprocal(..., approx=True)); everything else is f32.
    assert jnp.allclose(out, ref, atol=5e-3, rtol=5e-3), "mismatch vs pure-JAX reference"

    print("KERNEL_OK")
</pallas_src>

<mosaic_0001>
module attributes {stable_mosaic.version = 11 : i64} {
  func.func @transformer_block_kernel(%arg0: memref<16x16xf32, #tpu.memory_space<vmem>>, %arg1: memref<16x32xf32, #tpu.memory_space<vmem>>, %arg2: memref<16x32xf32, #tpu.memory_space<vmem>>, %arg3: memref<16x32xf32, #tpu.memory_space<vmem>>, %arg4: memref<32x32xf32, #tpu.memory_space<vmem>>, %arg5: memref<32x32xf32, #tpu.memory_space<vmem>>, %arg6: memref<32x32xf32, #tpu.memory_space<vmem>>, %arg7: memref<32x32xf32, #tpu.memory_space<vmem>>, %arg8: memref<32x64xf32, #tpu.memory_space<vmem>>, %arg9: memref<64x32xf32, #tpu.memory_space<vmem>>, %arg10: memref<8x64xf32, #tpu.memory_space<vmem>>, %arg11: memref<16x32xf32, #tpu.memory_space<vmem>>) attributes {dimension_semantics = [], scalar_prefetch = 0 : i64, scratch_operands = 0 : i64, tpu.core_type = #tpu.core_type<tc>} {
    %c0 = arith.constant 0 : index
    %c0_0 = arith.constant 0 : index
    %0 = vector.load %arg1[%c0, %c0_0] : memref<16x32xf32, #tpu.memory_space<vmem>>, vector<16x32xf32>
    %c0_1 = arith.constant 0 : index
    %c0_2 = arith.constant 0 : index
    %1 = vector.load %arg2[%c0_1, %c0_2] : memref<16x32xf32, #tpu.memory_space<vmem>>, vector<16x32xf32>
    %c0_3 = arith.constant 0 : index
    %c0_4 = arith.constant 0 : index
    %2 = vector.load %arg3[%c0_3, %c0_4] : memref<16x32xf32, #tpu.memory_space<vmem>>, vector<16x32xf32>
    %c0_5 = arith.constant 0 : index
    %c0_6 = arith.constant 0 : index
    %3 = vector.load %arg0[%c0_5, %c0_6] : memref<16x16xf32, #tpu.memory_space<vmem>>, vector<16x16xf32>
    %c0_7 = arith.constant 0 : index
    %c0_8 = arith.constant 0 : index
    %4 = vector.load %arg10[%c0_7, %c0_8] : memref<8x64xf32, #tpu.memory_space<vmem>>, vector<1x32xf32>
    %c1 = arith.constant 1 : index
    %c0_9 = arith.constant 0 : index
    %5 = vector.load %arg10[%c1, %c0_9] : memref<8x64xf32, #tpu.memory_space<vmem>>, vector<1x32xf32>
    %c2 = arith.constant 2 : index
    %c0_10 = arith.constant 0 : index
    %6 = vector.load %arg10[%c2, %c0_10] : memref<8x64xf32, #tpu.memory_space<vmem>>, vector<1x32xf32>
    %c3 = arith.constant 3 : index
    %c0_11 = arith.constant 0 : index
    %7 = vector.load %arg10[%c3, %c0_11] : memref<8x64xf32, #tpu.memory_space<vmem>>, vector<1x64xf32>
    %c4 = arith.constant 4 : index
    %c0_12 = arith.constant 0 : index
    %8 = vector.load %arg10[%c4, %c0_12] : memref<8x64xf32, #tpu.memory_space<vmem>>, vector<1x32xf32>
    %c5 = arith.constant 5 : index
    %c0_13 = arith.constant 0 : index
    %9 = vector.load %arg10[%c5, %c0_13] : memref<8x64xf32, #tpu.memory_space<vmem>>, vector<1x32xf32>
    %c6 = arith.constant 6 : index
    %c0_14 = arith.constant 0 : index
    %10 = vector.load %arg10[%c6, %c0_14] : memref<8x64xf32, #tpu.memory_space<vmem>>, vector<1x32xf32>
    %c0_15 = arith.constant 0 : index
    %c0_16 = arith.constant 0 : index
    %11 = vector.load %arg4[%c0_15, %c0_16] : memref<32x32xf32, #tpu.memory_space<vmem>>, vector<32x32xf32>
    %cst = arith.constant dense<0.000000e+00> : vector<16x32xf32>
    %12 = tpu.matmul %0, %11, %cst {dimension_numbers = #tpu.dot_dimension_numbers<[1], [0], [0], [1], [0, 0, 1, 1], [], []>} : vector<16x32xf32>, vector<32x32xf32>, vector<16x32xf32> -> vector<16x32xf32>
    %cst_17 = arith.constant 0.176776692 : f32
    %13 = vector.broadcast %cst_17 : f32 to vector<16x32xf32>
    %14 = arith.mulf %12, %13 : vector<16x32xf32>
    %c0_18 = arith.constant 0 : index
    %c0_19 = arith.constant 0 : index
    %15 = vector.load %arg5[%c0_18, %c0_19] : memref<32x32xf32, #tpu.memory_space<vmem>>, vector<32x32xf32>
    %cst_20 = arith.constant dense<0.000000e+00> : vector<16x32xf32>
    %16 = tpu.matmul %1, %15, %cst_20 {dimension_numbers = #tpu.dot_dimension_numbers<[1], [0], [0], [1], [0, 0, 1, 1], [], []>} : vector<16x32xf32>, vector<32x32xf32>, vector<16x32xf32> -> vector<16x32xf32>
    %c0_21 = arith.constant 0 : index
    %c0_22 = arith.constant 0 : index
    %17 = vector.load %arg6[%c0_21, %c0_22] : memref<32x32xf32, #tpu.memory_space<vmem>>, vector<32x32xf32>
    %cst_23 = arith.constant dense<0.000000e+00> : vector<16x32xf32>
    %18 = tpu.matmul %2, %17, %cst_23 {dimension_numbers = #tpu.dot_dimension_numbers<[1], [0], [0], [1], [0, 0, 1, 1], [], []>} : vector<16x32xf32>, vector<32x32xf32>, vector<16x32xf32> -> vector<16x32xf32>
    %19 = vector.extract_strided_slice %14 {offsets = [0, 0], sizes = [16, 8], strides = [1, 1]} : vector<16x32xf32> to vector<16x8xf32>
    %20 = vector.extract_strided_slice %16 {offsets = [0, 0], sizes = [16, 8], strides = [1, 1]} : vector<16x32xf32> to vector<16x8xf32>
    %cst_24 = arith.constant dense<0.000000e+00> : vector<16x16xf32>
    %21 = tpu.matmul %19, %20, %cst_24 {dimension_numbers = #tpu.dot_dimension_numbers<[1], [1], [0], [0], [0, 0, 1, 0], [], []>} : vector<16x8xf32>, vector<16x8xf32>, vector<16x16xf32> -> vector<16x16xf32>
    %22 = arith.addf %21, %3 : vector<16x16xf32>
    %cst_25 = arith.constant dense<0xFF800000> : vector<16xf32>
    %23 = vector.multi_reduction <maximumf>, %22, %cst_25 [1] : vector<16x16xf32> to vector<16xf32>
    %24 = vector.shape_cast %23 : vector<16xf32> to vector<16x1xf32>
    %25 = vector.broadcast %24 : vector<16x1xf32> to vector<16x16xf32>
    %26 = arith.subf %22, %25 : vector<16x16xf32>
    %27 = math.exp %26 : vector<16x16xf32>
    %cst_26 = arith.constant dense<0.000000e+00> : vector<16xf32>
    %28 = vector.multi_reduction <add>, %27, %cst_26 [1] : vector<16x16xf32> to vector<16xf32>
    %29 = vector.shape_cast %28 : vector<16xf32> to vector<16x1xf32>
    %30 = tpu.reciprocal %29 {approx = true} : vector<16x1xf32> -> vector<16x1xf32>
    %31 = vector.broadcast %30 : vector<16x1xf32> to vector<16x16xf32>
    %32 = arith.mulf %27, %31 : vector<16x16xf32>
    %33 = vector.extract_strided_slice %18 {offsets = [0, 0], sizes = [16, 8], strides = [1, 1]} : vector<16x32xf32> to vector<16x8xf32>
    %cst_27 = arith.constant dense<0.000000e+00> : vector<16x8xf32>
    %34 = tpu.matmul %32, %33, %cst_27 {dimension_numbers = #tpu.dot_dimension_numbers<[1], [0], [0], [1], [0, 0, 1, 1], [], []>} : vector<16x16xf32>, vector<16x8xf32>, vector<16x8xf32> -> vector<16x8xf32>
    %35 = vector.extract_strided_slice %14 {offsets = [0, 8], sizes = [16, 8], strides = [1, 1]} : vector<16x32xf32> to vector<16x8xf32>
    %36 = vector.extract_strided_slice %16 {offsets = [0, 8], sizes = [16, 8], strides = [1, 1]} : vector<16x32xf32> to vector<16x8xf32>
    %cst_28 = arith.constant dense<0.000000e+00> : vector<16x16xf32>
    %37 = tpu.matmul %35, %36, %cst_28 {dimension_numbers = #tpu.dot_dimension_numbers<[1], [1], [0], [0], [0, 0, 1, 0], [], []>} : vector<16x8xf32>, vector<16x8xf32>, vector<16x16xf32> -> vector<16x16xf32>
    %38 = arith.addf %37, %3 : vector<16x16xf32>
    %cst_29 = arith.constant dense<0xFF800000> : vector<16xf32>
    %39 = vector.multi_reduction <maximumf>, %38, %cst_29 [1] : vector<16x16xf32> to vector<16xf32>
    %40 = vector.shape_cast %39 : vector<16xf32> to vector<16x1xf32>
    %41 = vector.broadcast %40 : vector<16x1xf32> to vector<16x16xf32>
    %42 = arith.subf %38, %41 : vector<16x16xf32>
    %43 = math.exp %42 : vector<16x16xf32>
    %cst_30 = arith.constant dense<0.000000e+00> : vector<16xf32>
    %44 = vector.multi_reduction <add>, %43, %cst_30 [1] : vector<16x16xf32> to vector<16xf32>
    %45 = vector.shape_cast %44 : vector<16xf32> to vector<16x1xf32>
    %46 = tpu.reciprocal %45 {approx = true} : vector<16x1xf32> -> vector<16x1xf32>
    %47 = vector.broadcast %46 : vector<16x1xf32> to vector<16x16xf32>
    %48 = arith.mulf %43, %47 : vector<16x16xf32>
    %49 = vector.extract_strided_slice %18 {offsets = [0, 8], sizes = [16, 8], strides = [1, 1]} : vector<16x32xf32> to vector<16x8xf32>
    %cst_31 = arith.constant dense<0.000000e+00> : vector<16x8xf32>
    %50 = tpu.matmul %48, %49, %cst_31 {dimension_numbers = #tpu.dot_dimension_numbers<[1], [0], [0], [1], [0, 0, 1, 1], [], []>} : vector<16x16xf32>, vector<16x8xf32>, vector<16x8xf32> -> vector<16x8xf32>
    %51 = vector.extract_strided_slice %14 {offsets = [0, 16], sizes = [16, 8], strides = [1, 1]} : vector<16x32xf32> to vector<16x8xf32>
    %52 = vector.extract_strided_slice %16 {offsets = [0, 16], sizes = [16, 8], strides = [1, 1]} : vector<16x32xf32> to vector<16x8xf32>
    %cst_32 = arith.constant dense<0.000000e+00> : vector<16x16xf32>
    %53 = tpu.matmul %51, %52, %cst_32 {dimension_numbers = #tpu.dot_dimension_numbers<[1], [1], [0], [0], [0, 0, 1, 0], [], []>} : vector<16x8xf32>, vector<16x8xf32>, vector<16x16xf32> -> vector<16x16xf32>
    %54 = arith.addf %53, %3 : vector<16x16xf32>
    %cst_33 = arith.constant dense<0xFF800000> : vector<16xf32>
    %55 = vector.multi_reduction <maximumf>, %54, %cst_33 [1] : vector<16x16xf32> to vector<16xf32>
    %56 = vector.shape_cast %55 : vector<16xf32> to vector<16x1xf32>
    %57 = vector.broadcast %56 : vector<16x1xf32> to vector<16x16xf32>
    %58 = arith.subf %54, %57 : vector<16x16xf32>
    %59 = math.exp %58 : vector<16x16xf32>
    %cst_34 = arith.constant dense<0.000000e+00> : vector<16xf32>
    %60 = vector.multi_reduction <add>, %59, %cst_34 [1] : vector<16x16xf32> to vector<16xf32>
    %61 = vector.shape_cast %60 : vector<16xf32> to vector<16x1xf32>
    %62 = tpu.reciprocal %61 {approx = true} : vector<16x1xf32> -> vector<16x1xf32>
    %63 = vector.broadcast %62 : vector<16x1xf32> to vector<16x16xf32>
    %64 = arith.mulf %59, %63 : vector<16x16xf32>
    %65 = vector.extract_strided_slice %18 {offsets = [0, 16], sizes = [16, 8], strides = [1, 1]} : vector<16x32xf32> to vector<16x8xf32>
    %cst_35 = arith.constant dense<0.000000e+00> : vector<16x8xf32>
    %66 = tpu.matmul %64, %65, %cst_35 {dimension_numbers = #tpu.dot_dimension_numbers<[1], [0], [0], [1], [0, 0, 1, 1], [], []>} : vector<16x16xf32>, vector<16x8xf32>, vector<16x8xf32> -> vector<16x8xf32>
    %67 = vector.extract_strided_slice %14 {offsets = [0, 24], sizes = [16, 8], strides = [1, 1]} : vector<16x32xf32> to vector<16x8xf32>
    %68 = vector.extract_strided_slice %16 {offsets = [0, 24], sizes = [16, 8], strides = [1, 1]} : vector<16x32xf32> to vector<16x8xf32>
    %cst_36 = arith.constant dense<0.000000e+00> : vector<16x16xf32>
    %69 = tpu.matmul %67, %68, %cst_36 {dimension_numbers = #tpu.dot_dimension_numbers<[1], [1], [0], [0], [0, 0, 1, 0], [], []>} : vector<16x8xf32>, vector<16x8xf32>, vector<16x16xf32> -> vector<16x16xf32>
    %70 = arith.addf %69, %3 : vector<16x16xf32>
    %cst_37 = arith.constant dense<0xFF800000> : vector<16xf32>
    %71 = vector.multi_reduction <maximumf>, %70, %cst_37 [1] : vector<16x16xf32> to vector<16xf32>
    %72 = vector.shape_cast %71 : vector<16xf32> to vector<16x1xf32>
    %73 = vector.broadcast %72 : vector<16x1xf32> to vector<16x16xf32>
    %74 = arith.subf %70, %73 : vector<16x16xf32>
    %75 = math.exp %74 : vector<16x16xf32>
    %cst_38 = arith.constant dense<0.000000e+00> : vector<16xf32>
    %76 = vector.multi_reduction <add>, %75, %cst_38 [1] : vector<16x16xf32> to vector<16xf32>
    %77 = vector.shape_cast %76 : vector<16xf32> to vector<16x1xf32>
    %78 = tpu.reciprocal %77 {approx = true} : vector<16x1xf32> -> vector<16x1xf32>
    %79 = vector.broadcast %78 : vector<16x1xf32> to vector<16x16xf32>
    %80 = arith.mulf %75, %79 : vector<16x16xf32>
    %81 = vector.extract_strided_slice %18 {offsets = [0, 24], sizes = [16, 8], strides = [1, 1]} : vector<16x32xf32> to vector<16x8xf32>
    %cst_39 = arith.constant dense<0.000000e+00> : vector<16x8xf32>
    %82 = tpu.matmul %80, %81, %cst_39 {dimension_numbers = #tpu.dot_dimension_numbers<[1], [0], [0], [1], [0, 0, 1, 1], [], []>} : vector<16x16xf32>, vector<16x8xf32>, vector<16x8xf32> -> vector<16x8xf32>
    %83 = tpu.concatenate %34, %50, %66, %82 in 1 : vector<16x8xf32>, vector<16x8xf32>, vector<16x8xf32>, vector<16x8xf32> -> vector<16x32xf32>
    %c0_40 = arith.constant 0 : index
    %c0_41 = arith.constant 0 : index
    %84 = vector.load %arg7[%c0_40, %c0_41] : memref<32x32xf32, #tpu.memory_space<vmem>>, vector<32x32xf32>
    %cst_42 = arith.constant dense<0.000000e+00> : vector<16x32xf32>
    %85 = tpu.matmul %83, %84, %cst_42 {dimension_numbers = #tpu.dot_dimension_numbers<[1], [0], [0], [1], [0, 0, 1, 1], [], []>} : vector<16x32xf32>, vector<32x32xf32>, vector<16x32xf32> -> vector<16x32xf32>
    %86 = vector.broadcast %4 : vector<1x32xf32> to vector<16x32xf32>
    %87 = arith.addf %85, %86 : vector<16x32xf32>
    %88 = arith.addf %87, %0 : vector<16x32xf32>
    %cst_43 = arith.constant dense<0.000000e+00> : vector<16xf32>
    %89 = vector.multi_reduction <add>, %88, %cst_43 [1] : vector<16x32xf32> to vector<16xf32>
    %90 = vector.shape_cast %89 : vector<16xf32> to vector<16x1xf32>
    %cst_44 = arith.constant 3.200000e+01 : f32
    %91 = vector.broadcast %cst_44 : f32 to vector<16x1xf32>
    %92 = arith.divf %90, %91 : vector<16x1xf32>
    %93 = vector.broadcast %92 : vector<16x1xf32> to vector<16x32xf32>
    %94 = arith.subf %88, %93 : vector<16x32xf32>
    %95 = arith.mulf %94, %94 : vector<16x32xf32>
    %cst_45 = arith.constant dense<0.000000e+00> : vector<16xf32>
    %96 = vector.multi_reduction <add>, %95, %cst_45 [1] : vector<16x32xf32> to vector<16xf32>
    %97 = vector.shape_cast %96 : vector<16xf32> to vector<16x1xf32>
    %cst_46 = arith.constant 3.200000e+01 : f32
    %98 = vector.broadcast %cst_46 : f32 to vector<16x1xf32>
    %99 = arith.divf %97, %98 : vector<16x1xf32>
    %100 = vector.broadcast %92 : vector<16x1xf32> to vector<16x32xf32>
    %101 = arith.subf %88, %100 : vector<16x32xf32>
    %cst_47 = arith.constant 9.99999974E-6 : f32
    %102 = vector.broadcast %cst_47 : f32 to vector<16x1xf32>
    %103 = arith.addf %99, %102 : vector<16x1xf32>
    %104 = math.rsqrt %103 : vector<16x1xf32>
    %105 = vector.broadcast %104 : vector<16x1xf32> to vector<16x32xf32>
    %106 = arith.mulf %101, %105 : vector<16x32xf32>
    %107 = vector.broadcast %5 : vector<1x32xf32> to vector<16x32xf32>
    %108 = arith.mulf %106, %107 : vector<16x32xf32>
    %109 = vector.broadcast %6 : vector<1x32xf32> to vector<16x32xf32>
    %110 = arith.addf %108, %109 : vector<16x32xf32>
    %c0_48 = arith.constant 0 : index
    %c0_49 = arith.constant 0 : index
    %111 = vector.load %arg8[%c0_48, %c0_49] : memref<32x64xf32, #tpu.memory_space<vmem>>, vector<32x64xf32>
    %cst_50 = arith.constant dense<0.000000e+00> : vector<16x64xf32>
    %112 = tpu.matmul %110, %111, %cst_50 {dimension_numbers = #tpu.dot_dimension_numbers<[1], [0], [0], [1], [0, 0, 1, 1], [], []>} : vector<16x32xf32>, vector<32x64xf32>, vector<16x64xf32> -> vector<16x64xf32>
    %113 = vector.broadcast %7 : vector<1x64xf32> to vector<16x64xf32>
    %114 = arith.addf %112, %113 : vector<16x64xf32>
    %cst_51 = arith.constant 0.000000e+00 : f32
    %115 = vector.broadcast %cst_51 : f32 to vector<16x64xf32>
    %116 = arith.maximumf %114, %115 : vector<16x64xf32>
    %c0_52 = arith.constant 0 : index
    %c0_53 = arith.constant 0 : index
    %117 = vector.load %arg9[%c0_52, %c0_53] : memref<64x32xf32, #tpu.memory_space<vmem>>, vector<64x32xf32>
    %cst_54 = arith.constant dense<0.000000e+00> : vector<16x32xf32>
    %118 = tpu.matmul %116, %117, %cst_54 {dimension_numbers = #tpu.dot_dimension_numbers<[1], [0], [0], [1], [0, 0, 1, 1], [], []>} : vector<16x64xf32>, vector<64x32xf32>, vector<16x32xf32> -> vector<16x32xf32>
    %119 = vector.broadcast %8 : vector<1x32xf32> to vector<16x32xf32>
    %120 = arith.addf %118, %119 : vector<16x32xf32>
    %121 = arith.addf %120, %110 : vector<16x32xf32>
    %cst_55 = arith.constant dense<0.000000e+00> : vector<16xf32>
    %122 = vector.multi_reduction <add>, %121, %cst_55 [1] : vector<16x32xf32> to vector<16xf32>
    %123 = vector.shape_cast %122 : vector<16xf32> to vector<16x1xf32>
    %cst_56 = arith.constant 3.200000e+01 : f32
    %124 = vector.broadcast %cst_56 : f32 to vector<16x1xf32>
    %125 = arith.divf %123, %124 : vector<16x1xf32>
    %126 = vector.broadcast %125 : vector<16x1xf32> to vector<16x32xf32>
    %127 = arith.subf %121, %126 : vector<16x32xf32>
    %128 = arith.mulf %127, %127 : vector<16x32xf32>
    %cst_57 = arith.constant dense<0.000000e+00> : vector<16xf32>
    %129 = vector.multi_reduction <add>, %128, %cst_57 [1] : vector<16x32xf32> to vector<16xf32>
    %130 = vector.shape_cast %129 : vector<16xf32> to vector<16x1xf32>
    %cst_58 = arith.constant 3.200000e+01 : f32
    %131 = vector.broadcast %cst_58 : f32 to vector<16x1xf32>
    %132 = arith.divf %130, %131 : vector<16x1xf32>
    %133 = vector.broadcast %125 : vector<16x1xf32> to vector<16x32xf32>
    %134 = arith.subf %121, %133 : vector<16x32xf32>
    %cst_59 = arith.constant 9.99999974E-6 : f32
    %135 = vector.broadcast %cst_59 : f32 to vector<16x1xf32>
    %136 = arith.addf %132, %135 : vector<16x1xf32>
    %137 = math.rsqrt %136 : vector<16x1xf32>
    %138 = vector.broadcast %137 : vector<16x1xf32> to vector<16x32xf32>
    %139 = arith.mulf %134, %138 : vector<16x32xf32>
    %140 = vector.broadcast %9 : vector<1x32xf32> to vector<16x32xf32>
    %141 = arith.mulf %139, %140 : vector<16x32xf32>
    %142 = vector.broadcast %10 : vector<1x32xf32> to vector<16x32xf32>
    %143 = arith.addf %141, %142 : vector<16x32xf32>
    %c0_60 = arith.constant 0 : index
    %c0_61 = arith.constant 0 : index
    %144 = vector.load %arg11[%c0_60, %c0_61] : memref<16x32xf32, #tpu.memory_space<vmem>>, vector<16x32xf32>
    tpu.vector_store %arg11[%c0_60, %c0_61], %143 {strides = array<i32>} : memref<16x32xf32, #tpu.memory_space<vmem>>, vector<16x32xf32>,
    return
  }
}

</mosaic_0001>

<bundles_post_ra>
// kernel: tpu_custom_call.1
= control target key start
LH: loop header
LB: loop body
LE: loop exit
PB: predicated region body
PF: predicated region fallthrough
CT: control target
= control target key end

     0   :  { %16 = vsyncpa [#allocation3], 0  ;;  %s2638_s0 = inlined_call_operand.hbm [shape: f32[16,16], index: 0, kind: input, shape index: {}]   ;;  %s2639_s1 = inlined_call_operand.hbm [shape: f32[16,32], index: 1, kind: input, shape index: {}]   ;;  %s2640_s2 = inlined_call_operand.hbm [shape: f32[16,32], index: 2, kind: input, shape index: {}]   ;;  %s2641_s3 = inlined_call_operand.hbm [shape: f32[16,32], index: 3, kind: input, shape index: {}]   ;;  %s2642_s4 = inlined_call_operand.vmem [shape: f32[32,32], index: 4, kind: input, shape index: {}]   ;;  %s2643_s5 = inlined_call_operand.vmem [shape: f32[32,32], index: 5, kind: input, shape index: {}]   ;;  %s2644_s6 = inlined_call_operand.vmem [shape: f32[32,32], index: 6, kind: input, shape index: {}]   ;;  %s2645_s7 = inlined_call_operand.hbm [shape: f32[32,32], index: 7, kind: input, shape index: {}]   ;;  %s2646_s8 = inlined_call_operand.hbm [shape: f32[32,64], index: 8, kind: input, shape index: {}]   ;;  %s2647_s9 = inlined_call_operand.vmem [shape: f32[64,32], index: 9, kind: input, shape index: {}]   ;;  %s2648_s10 = inlined_call_operand.hbm [shape: f32[8,64], index: 10, kind: input, shape index: {}]   ;;  %s2649_s11 = inlined_call_operand.hbm [shape: f32[16,32], index: 11, kind: output, shape index: {}]  }
   0x1   :  { %17 = vsyncpa [#allocation6], 0 }
   0x2   :  { %18 = vsyncpa [#allocation9], 0 }
   0x3   :  { %19 = vsyncpa [#allocation12], 0 }
   0x4   :  { %20 = vsyncpa [#allocation4], 0  ;;  %s2219_s17 = smov [#allocation5]   ;;  %s2220_s19 = smov [#allocation8]  }
   0x5   :  { %s38_s18 = sshll.u32 %s2219_s17, 4  ;;  %s62_s20 = sshll.u32 %s2220_s19, 4  ;;  %s39_s18 = int_to_ptr.vmem [resolvable:$true] %s38_s18  ;;  %s2294_s20 = int_to_ptr.vmem [resolvable:$true] %s62_s20 }
   0x6   :  { %s2033_s23 = scalar_lea.hbm %s2639_s1, 256 }
   0x7   :  { %p2034_p0 = scmp.ne.s32.totalorder %s2639_s1, %s2033_s23  ;;  %p2037_p1 = scmp.lt.u32.totalorder %s2033_s23, %s2639_s1 }
   0x9   :  { %p2039_p2 = pnand %p2037_p1, %p2034_p0 }
   0xb   :  { %2042 = shalt.err (!%p2039_p2)
}
   0xc   :  { %s2043_s28 = scalar_lea.vmem %s39_s18, 256  ;;  %p2048_p4 = scmp.lt.s32.totalorder %s39_s18, %s39_s18 }
   0xd   :  { %p2044_p3 = scmp.ne.s32.totalorder %s39_s18, %s2043_s28  ;;  %p2049_p5 = scmp.lt.s32.totalorder %s2043_s28, %s2043_s28 }
   0xf   :  { %p2050_p6 = por %p2049_p5, %p2048_p4 }
  0x11   :  { %p2051_p7 = pnand %p2050_p6, %p2044_p3 }
  0x13   :  { %2054 = shalt.err (!%p2051_p7)
}
  0x14   :  { %s2221_s29 = smov 128   ;;  %s2222_s30 = smov 8  }
  0x15   :  { %44 = dma.hbm_to_vmem [thread:$0]  %s2639_s1, 256, %s39_s18, [#allocation6], %s2221_s29, %s2221_s29, %s2222_s30  }
  0x16   :  { %s2055_s16 = scalar_lea.hbm %s2641_s3, 256 }
  0x17   :  { %p2056_p8 = scmp.ne.s32.totalorder %s2641_s3, %s2055_s16  ;;  %p2059_p9 = scmp.lt.u32.totalorder %s2055_s16, %s2641_s3 }
  0x19   :  { %p2061_p10 = pnand %p2059_p9, %p2056_p8 }
  0x1b   :  { %2064 = shalt.err (!%p2061_p10)
}
  0x1c   :  { %s2065_s23 = scalar_lea.vmem %s2294_s20, 256  ;;  %p2070_p12 = scmp.lt.s32.totalorder %s2294_s20, %s2294_s20 }
  0x1d   :  { %p2066_p11 = scmp.ne.s32.totalorder %s2294_s20, %s2065_s23  ;;  %p2071_p13 = scmp.lt.s32.totalorder %s2065_s23, %s2065_s23 }
  0x1f   :  { %p2072_p0 = por %p2071_p13, %p2070_p12 }
  0x21   :  { %p2073_p1 = pnand %p2072_p0, %p2066_p11 }
  0x23   :  { %2076 = shalt.err (!%p2073_p1)
}
  0x24   :  { %68 = dma.hbm_to_vmem [thread:$0]  %s2641_s3, 256, %s2294_s20, [#allocation9], %s2221_s29, %s2221_s29, %s2222_s30  }
  0x25   :  { %s2223_s24 = smov [#allocation11]   ;;  %s2224_s26 = smov [#allocation2]  }
  0x26   :  { %s92_s25 = sshll.u32 %s2223_s24, 4  ;;  %s26_s27 = sshll.u32 %s2224_s26, 4  ;;  %s93_s25 = int_to_ptr.vmem [resolvable:$true] %s92_s25  ;;  %s2331_s27 = int_to_ptr.vmem [resolvable:$true] %s26_s27 }
  0x27   :  { %s2077_s13 = scalar_lea.hbm %s2646_s8, 512 }
  0x28   :  { %p2078_p2 = scmp.ne.s32.totalorder %s2646_s8, %s2077_s13  ;;  %p2081_p3 = scmp.lt.u32.totalorder %s2077_s13, %s2646_s8 }
  0x2a   :  { %p2083_p4 = pnand %p2081_p3, %p2078_p2 }
  0x2c   :  { %2086 = shalt.err (!%p2083_p4)
}
  0x2d   :  { %s2087_s3 = scalar_lea.vmem %s93_s25, 512  ;;  %p2092_p6 = scmp.lt.s32.totalorder %s93_s25, %s93_s25 }
  0x2e   :  { %p2088_p5 = scmp.ne.s32.totalorder %s93_s25, %s2087_s3  ;;  %p2093_p7 = scmp.lt.s32.totalorder %s2087_s3, %s2087_s3 }
  0x30   :  { %p2094_p8 = por %p2093_p7, %p2092_p6 }
  0x32   :  { %p2095_p9 = pnand %p2094_p8, %p2088_p5 }
  0x34   :  { %2098 = shalt.err (!%p2095_p9)
}
  0x35   :  { %98 = dma.hbm_to_vmem [thread:$0]  %s2646_s8, 512, %s93_s25, [#allocation12], %s2221_s29, %s2221_s29, %s2222_s30  }
  0x36   :  { %s2099_s23 = scalar_lea.hbm %s2638_s0, 256 }
  0x37   :  { %p2100_p10 = scmp.ne.s32.totalorder %s2638_s0, %s2099_s23  ;;  %p2103_p11 = scmp.lt.u32.totalorder %s2099_s23, %s2638_s0 }
  0x39   :  { %p2105_p12 = pnand %p2103_p11, %p2100_p10 }
  0x3b   :  { %2108 = shalt.err (!%p2105_p12)
}
  0x3c   :  { %s2109_s28 = scalar_lea.vmem %s2331_s27, 256  ;;  %p2114_p0 = scmp.lt.s32.totalorder %s2331_s27, %s2331_s27 }
  0x3d   :  { %p2110_p13 = scmp.ne.s32.totalorder %s2331_s27, %s2109_s28  ;;  %p2115_p1 = scmp.lt.s32.totalorder %s2109_s28, %s2109_s28 }
  0x3f   :  { %p2116_p2 = por %p2115_p1, %p2114_p0 }
  0x41   :  { %p2117_p3 = pnand %p2116_p2, %p2110_p13 }
  0x43   :  { %2120 = shalt.err (!%p2117_p3)
}
  0x44   :  { %32 = dma.hbm_to_vmem [thread:$0]  %s2638_s0, 256, %s2331_s27, [#allocation3], %s2221_s29, %s2221_s29, %s2222_s30  }
  0x45   :  { %s2225_s12 = smov [#allocation7]   ;;  %s2226_s14 = smov [#allocation10]  }
  0x46   :  { %s50_s13 = sshll.u32 %s2225_s12, 4  ;;  %s80_s15 = sshll.u32 %s2226_s14, 4  ;;  %s51_s13 = int_to_ptr.vmem [resolvable:$true] %s50_s13  ;;  %s2368_s15 = int_to_ptr.vmem [resolvable:$true] %s80_s15 }
  0x47   :  { %s2121_s3 = scalar_lea.hbm %s2640_s2, 256 }
  0x48   :  { %p2122_p4 = scmp.ne.s32.totalorder %s2640_s2, %s2121_s3  ;;  %p2125_p5 = scmp.lt.u32.totalorder %s2121_s3, %s2640_s2 }
  0x4a   :  { %p2127_p6 = pnand %p2125_p5, %p2122_p4 }
  0x4c   :  { %2130 = shalt.err (!%p2127_p6)
}
  0x4d   :  { %s2131_s0 = scalar_lea.vmem %s51_s13, 256  ;;  %p2136_p8 = scmp.lt.s32.totalorder %s51_s13, %s51_s13 }
  0x4e   :  { %p2132_p7 = scmp.ne.s32.totalorder %s51_s13, %s2131_s0  ;;  %p2137_p9 = scmp.lt.s32.totalorder %s2131_s0, %s2131_s0 }
  0x50   :  { %p2138_p10 = por %p2137_p9, %p2136_p8 }
  0x52   :  { %p2139_p11 = pnand %p2138_p10, %p2132_p7 }
  0x54   :  { %2142 = shalt.err (!%p2139_p11)
}
  0x55   :  { %56 = dma.hbm_to_vmem [thread:$0]  %s2640_s2, 256, %s51_s13, [#allocation6], %s2221_s29, %s2221_s29, %s2222_s30  }
  0x56   :  { %s2143_s24 = scalar_lea.hbm %s2645_s7, 512 }
  0x57   :  { %p2144_p12 = scmp.ne.s32.totalorder %s2645_s7, %s2143_s24  ;;  %p2147_p13 = scmp.lt.u32.totalorder %s2143_s24, %s2645_s7 }
  0x59   :  { %p2149_p0 = pnand %p2147_p13, %p2144_p12 }
  0x5b   :  { %2152 = shalt.err (!%p2149_p0)
}
  0x5c   :  { %s2153_s12 = scalar_lea.vmem %s2368_s15, 512  ;;  %p2158_p2 = scmp.lt.s32.totalorder %s2368_s15, %s2368_s15 }
  0x5d   :  { %p2154_p1 = scmp.ne.s32.totalorder %s2368_s15, %s2153_s12  ;;  %p2159_p3 = scmp.lt.s32.totalorder %s2153_s12, %s2153_s12 }
  0x5f   :  { %p2160_p4 = por %p2159_p3, %p2158_p2 }
  0x61   :  { %p2161_p5 = pnand %p2160_p4, %p2154_p1 }
  0x63   :  { %2164 = shalt.err (!%p2161_p5)
}
  0x64   :  { %86 = dma.hbm_to_vmem [thread:$0]  %s2645_s7, 512, %s2368_s15, [#allocation9], %s2221_s29, %s2221_s29, %s2222_s30  }
  0x65   :  { %s2227_s14 = smov [#allocation13]   ;;  %s2165_s20 = scalar_lea.hbm %s2648_s10, 128 }
  0x66   :  { %s107_s16 = sshll.u32 %s2227_s14, 4  ;;  %p2166_p6 = scmp.ne.s32.totalorder %s2648_s10, %s2165_s20  ;;  %s108_s16 = int_to_ptr.vmem [resolvable:$true] %s107_s16 }
  0x67   :  { %p2169_p7 = scmp.lt.u32.totalorder %s2165_s20, %s2648_s10 }
  0x69   :  { %p2171_p8 = pnand %p2169_p7, %p2166_p6 }
  0x6b   :  { %2174 = shalt.err (!%p2171_p8)
}
  0x6c   :  { %s2175_s27 = scalar_lea.vmem %s108_s16, 128  ;;  %p2180_p10 = scmp.lt.s32.totalorder %s108_s16, %s108_s16 }
  0x6d   :  { %p2176_p9 = scmp.ne.s32.totalorder %s108_s16, %s2175_s27  ;;  %p2181_p11 = scmp.lt.s32.totalorder %s2175_s27, %s2175_s27 }
  0x6f   :  { %p2182_p12 = por %p2181_p11, %p2180_p10 }
  0x71   :  { %p2183_p13 = pnand %p2182_p12, %p2176_p9 }
  0x73   :  { %2186 = shalt.err (!%p2183_p13)
}
  0x74   :  { %110 = dma.hbm_to_vmem [thread:$0]  %s2648_s10, 128, %s108_s16, [#allocation12]  }
  0x75   :  { %2209 = dma.done.wait [#allocation3], 256  }
  0x76   :  { %2210 = vsyncadd [#allocation3], 4294967040 }
  0x77   :  { %2211 = dma.done.wait [#allocation6], 512  }
  0x78   :  { %2212 = vsyncadd [#allocation6], 4294966784 }
  0x79   :  { %2213 = dma.done.wait [#allocation9], 768  }
  0x7a   :  { %2214 = vsyncadd [#allocation9], 4294966528 }
  0x7b   :  { %2215 = dma.done.wait [#allocation12], 640  }
  0x7c   :  { %2216 = vsyncadd [#allocation12], 4294966656  ;;  %vm151_vm0 = vcmask 261120   ;;  %v147_v0 = vld [vmem:[%s2642_s4] sm:$0xff]  ;;  %v148_v1 = vld [vmem:[%s2642_s4 + $0x8] sm:$0xff]  ;;  %vm405_vm1 = vcmask 64512  }
  0x7d   :  { %v149_v2 = vld [vmem:[%s2642_s4 + $0x10] sm:$0xff]  ;;  %v1852_v3 = vpack.c.bf16 %v148_v1, %v147_v0  ;;  %v150_v4 = vld [vmem:[%s2642_s4 + $0x18] sm:$0xff]  ;;  %v235_v7 = vld [vmem:[%s2643_s5] sm:$0xff]  ;;  %vm493_vm3 = vcmask 130048   ;;  %s2230_s15 = smov 104   ;;  %s2231_s23 = smov 16  }
  0x7e   :  { %v2429_v5 = vld [vmem:[#allocation5] sm:$0xff]  ;;  %v1856_v6 = vpack.c.bf16 %v150_v4, %v149_v2  ;;  %v236_v8 = vld [vmem:[%s2643_s5 + $0x8] sm:$0xff]  ;;  %v238_v11 = vld [vmem:[%s2643_s5 + $0x18] sm:$0xff]  ;;  %s2232_s1 = smov 24   ;;  %vm1227_vm4 = vcmask 195584   ;;  %vm1463_vm5 = vcmask 523264  }
  0x7f   :  { %1730 = vmatprep.mubr.msk.f32.mxu1 %vm151_vm0, %v2429_v5  ;;  %1853 = vmatprep.subr.bf16.mxu1 %v1852_v3  ;;  %v1860_v9 = vpack.c.bf16 %v236_v8, %v235_v7  ;;  %v237_v10 = vld [vmem:[%s2643_s5 + $0x10] sm:$0xff]  ;;  %v2445_v12 = vld [vmem:[#allocation5 + $0x8] sm:$0xff]  ;;  %v134_v14 = vld [vmem:[#allocation7] sm:$0xff]  ;;  %s2228_s5 = smov 120  }
  0x80   :  { %1855 = vmatpush3.bf16.msra.mxu1 %v1852_v3  ;;  %v1864_v13 = vpack.c.bf16 %v238_v11, %v237_v10  ;;  %v135_v15 = vld [vmem:[#allocation7 + $0x8] sm:$0xff]  ;;  %vm2461_vm2 = vmpackc.low %vm405_vm1, %vm405_vm1  ;;  %v320_v25 = vld [vmem:[%s2644_s6] sm:$0xff] }
  0x81   :  { %1857 = vmatprep.subr.bf16.mxu1 %v1856_v6  ;;  %v321_v26 = vld [vmem:[%s2644_s6 + $0x8] sm:$0xff]  ;;  %v322_v27 = vld [vmem:[%s2644_s6 + $0x10] sm:$0xff]  ;;  %v323_v29 = vld [vmem:[%s2644_s6 + $0x18] sm:$0xff]  ;;  %s2229_s6 = smov 112  }
  0x82   :  { %v1868_v28 = vpack.c.bf16 %v321_v26, %v320_v25  ;;  %v136_v30 = vld [vmem:[#allocation8] sm:$0xff]  ;;  %v1872_v31 = vpack.c.bf16 %v323_v29, %v322_v27  ;;  %v137_v32 = vld [vmem:[#allocation8 + $0x8] sm:$0xff]  ;;  %v2497_v39 = vld [vmem:[#allocation2 + $0x8] sm:$0xff] }
  0x83   :  { %1752 = vmatprep.mubr.msk.f32.mxu0 %vm151_vm0, %v136_v30  ;;  %v2499_v40 = vld [vmem:[#allocation2] sm:$0xff] }
  0x84   :  { %1859 = vmatpush3.bf16.msra.mxu1 %v1856_v6  ;;  %1869 = vmatprep.subr.bf16.mxu0 %v1868_v28 }
  0x85   :  { %1861 = vmatprep.subr.bf16.mxu1 %v1860_v9  ;;  %1871 = vmatpush3.bf16.msra.mxu0 %v1868_v28 }
  0x86   :  { %1873 = vmatprep.subr.bf16.mxu0 %v1872_v31 }
  0x87   :  { %1731 = vmatmul.mubr.msk.f32.vlgmr.msra.gmra.mrb[0].mxu1 %vm151_vm0, %v2445_v12 }
  0x88   :  { %1863 = vmatpush3.bf16.msra.mxu1 %v1860_v9  ;;  %1741 = vmatprep.mubr.msk.f32.mxu1 %vm151_vm0, %v134_v14 }
  0x89   :  { %1865 = vmatprep.subr.bf16.mxu1 %v1864_v13  ;;  %1875 = vmatpush3.bf16.msra.mxu0 %v1872_v31 }
  0x8c   :  { %1867 = vmatpush3.bf16.msra.mxu1 %v1864_v13  ;;  %1753 = vmatmul.mubr.msk.f32.vlgmr.msra.gmra.mrb[0].mxu0 %vm151_vm0, %v137_v32 }
  0x8f   :  { %1742 = vmatmul.mubr.msk.f32.vlgmr.msra.gmra.mrb[2].mxu1 %vm151_vm0, %v135_v15 }
 0x15a   :  { %v1732_v16 = vpop.f32.mrb[0].mxu1 }
 0x15b   :  { %v2451_v17 = vmul.f32 0.17677669, %v1732_v16  ;;  %v224_v18 = vpop.f32.mrb[1].mxu1 }
 0x15c   :  { %v2453_v19 = vmul.f32 0.17677669, %v224_v18 }
 0x15d   :  { %599 = vrot.lane.b32.xlu1 %v2451_v17, %s2228_s5 }
 0x15e   :  { %1759 = vmatprep.mubr.msk.f32.mxu1 %vm405_vm1, %v2453_v19 }
 0x15f   :  { %v1754_v63 = vpop.f32.mrb[0].mxu0 }
 0x160   :  { %v396_v0 = vpop.f32.mrb[1].mxu0 }
 0x161   :  { %v2511_v1 = vpack.i.bf16 %v1754_v63, %v396_v0  ;;  %v1882_v2 = vpack.c.bf16 %v1754_v63, %v396_v0 }
 0x162   :  { %v1743_v20 = vpop.f32.mrb[2].mxu1 }
 0x163   :  { %v311_v21 = vpop.f32.mrb[3].mxu1  ;;  %1883 = vmatprep.subr.bf16.mxu0 %v1882_v2 }
 0x164   :  { %v1876_v23 = vpack.c.bf16 %v1743_v20, %v311_v21  ;;  %v2465_v24 = vpack.i.bf16 %v1743_v20, %v311_v21  ;;  %1885 = vmatpush3.bf16.msra.mxu0 %v1882_v2 }
 0x166   :  { %1964 = vrot.lane.b32.xlu0 %v2465_v24, %s2228_s5  ;;  %1878 = vmatprep.subr.msk.bf16.mxu1 %vm2461_vm2, %v1876_v23 }
 0x167   :  { %1881 = vmatpush3.bf16.xpose.msk.msra.mxu1 %vm2461_vm2, %v1876_v23 }
 0x16a   :  { %597 = vrot.lane.b32.xlu0 %v2453_v19, %s2228_s5 }
 0x16e   :  { %1760 = vmatmul.mubr.msk.f32.vlgmr.msra.gmra.mrb[4].mxu1 %vm405_vm1, %v2451_v17 }
 0x1cf   :  { %v600_v38 = vpop.permute.xlu1 %599 }
 0x1d8   :  { %v1965_v33 = vpop.permute.xlu0 %1964 }
 0x1d9   :  { %v1967_v34 = vunpack.i.h.bf16 %v1965_v33  ;;  %v1966_v35 = vunpack.i.l.bf16 %v1965_v33 }
 0x1db   :  { %v1886_v36 = vpack.c.bf16 %v1967_v34, %v1966_v35 }
 0x1dc   :  { %v598_v37 = vpop.permute.xlu0 %597 }
 0x1dd   :  { %1888 = vmatprep.subr.msk.bf16.mxu1 %vm2461_vm2, %v1886_v36  ;;  %1773 = vmatprep.mubr.msk.f32.mxu1 %vm405_vm1, %v598_v37 }
 0x1de   :  { %1891 = vmatpush3.bf16.xpose.msk.msra.mxu1 %vm2461_vm2, %v1886_v36 }
 0x1e5   :  { %1774 = vmatmul.mubr.msk.f32.vlgmr.msra.gmra.mrb[6].mxu1 %vm405_vm1, %v600_v38 }
 0x241   :  { %v1761_v41 = vpop.f32.mrb[4].mxu1 }
 0x242   :  { %v490_v42 = vadd.f32 %v1761_v41, %v2497_v39  ;;  %v484_v43 = vpop.f32.mrb[5].mxu1 }
 0x243   :  { %v485_v44 = vadd.f32 %v484_v43, %v2499_v40 }
 0x244   :  { %v497_v45 = vsel %vm493_vm3, %v490_v42, -inf }
 0x245   :  { %498 = vmax.xlane.f32.xlu0 %v497_v45  ;;  %v494_v46 = vsel %vm493_vm3, %v485_v44, -inf }
 0x246   :  { %495 = vmax.xlane.f32.xlu1 %v494_v46 }
 0x2b8   :  { %v1775_v47 = vpop.f32.mrb[6].mxu1 }
 0x2b9   :  { %v685_v48 = vadd.f32 %v1775_v47, %v2497_v39  ;;  %v679_v49 = vpop.f32.mrb[7].mxu1 }
 0x2ba   :  { %v680_v50 = vadd.f32 %v679_v49, %v2499_v40 }
 0x2bb   :  { %v691_v51 = vsel %vm493_vm3, %v685_v48, -inf }
 0x2bc   :  { %692 = vmax.xlane.f32.xlu1 %v691_v51  ;;  %v688_v52 = vsel %vm493_vm3, %v680_v50, -inf }
 0x2bd   :  { %689 = vmax.xlane.f32.xlu0 %v688_v52 }
 0x2d2   :  { %v499_v53 = vpop.xlane.xlu0 %498 }
 0x2d3   :  { %v501_v54 = vsub.f32 %v490_v42, %v499_v53  ;;  %v496_v55 = vpop.xlane.xlu1 %495 }
 0x2d4   :  { %v500_v56 = vsub.f32 %v485_v44, %v496_v55 }
 0x2d5   :  { %v504_v57 = vmul.f32 1.442695, %v501_v54 }
 0x2d6   :  { %v502_v58 = vmul.f32 1.442695, %v500_v56 }
 0x2d7   :  { %1993 = vpow2.f32 %v504_v57 }
 0x2d8   :  { %1995 = vpow2.f32 %v502_v58 }
 0x2e1   :  { %v1994_v59 = vpop.eup %1993 }
 0x2e2   :  { %v1996_v60 = vpop.eup %1995  ;;  %v509_v61 = vsel %vm493_vm3, %v1994_v59, 0.0 }
 0x2e3   :  { %510 = vadd.xlane.f32.xlu1 %v509_v61  ;;  %v506_v62 = vsel %vm493_vm3, %v1996_v60, 0.0 }
 0x2e4   :  { %507 = vadd.xlane.f32.xlu0 %v506_v62 }
 0x349   :  { %v693_v3 = vpop.xlane.xlu1 %692 }
 0x34a   :  { %v695_v4 = vsub.f32 %v685_v48, %v693_v3  ;;  %v690_v6 = vpop.xlane.xlu0 %689 }
 0x34b   :  { %v694_v7 = vsub.f32 %v680_v50, %v690_v6 }
 0x34c   :  { %v698_v8 = vmul.f32 1.442695, %v695_v4 }
 0x34d   :  { %v696_v9 = vmul.f32 1.442695, %v694_v7 }
 0x34e   :  { %1997 = vpow2.f32 %v698_v8 }
 0x34f   :  { %1999 = vpow2.f32 %v696_v9 }
 0x358   :  { %v1998_v10 = vpop.eup %1997 }
 0x359   :  { %v2000_v11 = vpop.eup %1999  ;;  %v703_v13 = vsel %vm493_vm3, %v1998_v10, 0.0 }
 0x35a   :  { %704 = vadd.xlane.f32.xlu1 %v703_v13  ;;  %v700_v14 = vsel %vm493_vm3, %v2000_v11, 0.0 }
 0x35b   :  { %701 = vadd.xlane.f32.xlu0 %v700_v14 }
 0x36b   :  { %1974 = vrot.lane.b32.xlu1 %v2465_v24, %s2229_s6 }
 0x36f   :  { %799 = vrot.lane.b32.xlu1 %v2453_v19, %s2229_s6 }
 0x370   :  { %v511_v15 = vpop.xlane.xlu1 %510 }
 0x371   :  { %2001 = vrcp.f32 %v511_v15  ;;  %1969 = vrot.lane.b32.xlu0 %v2511_v1, %s2228_s5  ;;  %v508_v16 = vpop.xlane.xlu0 %507 }
 0x372   :  { %2003 = vrcp.f32 %v508_v16 }
 0x375   :  { %801 = vrot.lane.b32.xlu0 %v2451_v17, %s2229_s6 }
 0x37b   :  { %v2002_v18 = vpop.eup %2001 }
 0x37c   :  { %v2004_v20 = vpop.eup %2003  ;;  %v515_v23 = vmul.f32 %v2002_v18, %v1994_v59 }
 0x37d   :  { %v514_v21 = vmul.f32 %v2004_v20, %v1996_v60 }
 0x37f   :  { %1766 = vmatprep.mubr.msk.f32.mxu0 %vm493_vm3, %v514_v21 }
 0x380   :  { %1767 = vmatmul.mubr.msk.f32.vlgmr.msra.gmra.mrb[2].mxu0 %vm493_vm3, %v515_v23 }
 0x3e7   :  { %v705_v25 = vpop.xlane.xlu1 %704 }
 0x3e8   :  { %2005 = vrcp.f32 %v705_v25  ;;  %v702_v26 = vpop.xlane.xlu0 %701 }
 0x3e9   :  { %2007 = vrcp.f32 %v702_v26 }
 0x3eb   :  { %v1975_v27 = vpop.permute.xlu1 %1974 }
 0x3ec   :  { %v1970_v28 = vpop.permute.xlu0 %1969  ;;  %v1977_v29 = vunpack.i.h.bf16 %v1975_v27  ;;  %v1976_v30 = vunpack.i.l.bf16 %v1975_v27 }
 0x3ed   :  { %v1972_v31 = vunpack.i.h.bf16 %v1970_v28  ;;  %v1971_v32 = vunpack.i.l.bf16 %v1970_v28 }
 0x3ee   :  { %v1896_v34 = vpack.c.bf16 %v1977_v29, %v1976_v30 }
 0x3ef   :  { %v1892_v33 = vpack.c.bf16 %v1972_v31, %v1971_v32  ;;  %v800_v41 = vpop.permute.xlu1 %799 }
 0x3f0   :  { %v802_v42 = vpop.permute.xlu0 %801 }
 0x3f1   :  { %1893 = vmatprep.subr.bf16.mxu0 %v1892_v33 }
 0x3f2   :  { %v2006_v35 = vpop.eup %2005  ;;  %1895 = vmatpush3.bf16.msra.mxu0 %v1892_v33 }
 0x3f3   :  { %v2008_v36 = vpop.eup %2007  ;;  %1898 = vmatprep.subr.msk.bf16.mxu0 %vm2461_vm2, %v1896_v34  ;;  %v709_v38 = vmul.f32 %v2006_v35, %v1998_v10 }
 0x3f4   :  { %v708_v37 = vmul.f32 %v2008_v36, %v2000_v11 }
 0x3f6   :  { %1780 = vmatprep.mubr.msk.f32.mxu0 %vm493_vm3, %v708_v37 }
 0x3f7   :  { %1781 = vmatmul.mubr.msk.f32.vlgmr.msra.gmra.mrb[4].mxu0 %vm493_vm3, %v709_v38 }
 0x3f8   :  { %1787 = vmatprep.mubr.msk.f32.mxu0 %vm405_vm1, %v800_v41 }
 0x3fb   :  { %1901 = vmatpush3.bf16.xpose.msk.msra.mxu0 %vm2461_vm2, %v1896_v34 }
 0x402   :  { %1788 = vmatmul.mubr.msk.f32.vlgmr.msra.gmra.mrb[6].mxu0 %vm405_vm1, %v802_v42 }
 0x453   :  { %v2533_v43 = vpop.f32.mrb[2].mxu0 }
 0x454   :  { %v2535_v44 = vpop.f32.mrb[3].mxu0 }
 0x4ca   :  { %v2537_v45 = vpop.f32.mrb[4].mxu0 }
 0x4cb   :  { %v2539_v46 = vpop.f32.mrb[5].mxu0 }
 0x4d5   :  { %v1789_v47 = vpop.f32.mrb[6].mxu0 }
 0x4d6   :  { %v887_v48 = vadd.f32 %v1789_v47, %v2497_v39  ;;  %v881_v49 = vpop.f32.mrb[7].mxu0 }
 0x4d7   :  { %v882_v50 = vadd.f32 %v881_v49, %v2499_v40  ;;  %v1232_v49 = vld [vmem:[#allocation10 + $0x10] sm:$0xff] }
 0x4d8   :  { %v893_v51 = vsel %vm493_vm3, %v887_v48, -inf }
 0x4d9   :  { %894 = vmax.xlane.f32.xlu0 %v893_v51  ;;  %v890_v52 = vsel %vm493_vm3, %v882_v50, -inf  ;;  %v1233_v51 = vld [vmem:[#allocation10 + $0x18] sm:$0xff] }
 0x4da   :  { %891 = vmax.xlane.f32.xlu1 %v890_v52  ;;  %v1920_v52 = vpack.c.bf16 %v1233_v51, %v1232_v49 }
 0x566   :  { %v895_v53 = vpop.xlane.xlu0 %894 }
 0x567   :  { %v897_v54 = vsub.f32 %v887_v48, %v895_v53  ;;  %v892_v55 = vpop.xlane.xlu1 %891  ;;  %v1231_v48 = vld [vmem:[#allocation10 + $0x8] sm:$0xff] }
 0x568   :  { %v896_v56 = vsub.f32 %v882_v50, %v892_v55 }
 0x569   :  { %v900_v57 = vmul.f32 1.442695, %v897_v54 }
 0x56a   :  { %v898_v58 = vmul.f32 1.442695, %v896_v56 }
 0x56b   :  { %2009 = vpow2.f32 %v900_v57 }
 0x56c   :  { %2011 = vpow2.f32 %v898_v58 }
 0x575   :  { %v2010_v59 = vpop.eup %2009 }
 0x576   :  { %v2012_v60 = vpop.eup %2011  ;;  %v905_v61 = vsel %vm493_vm3, %v2010_v59, 0.0 }
 0x577   :  { %906 = vadd.xlane.f32.xlu1 %v905_v61  ;;  %v902_v62 = vsel %vm493_vm3, %v2012_v60, 0.0 }
 0x578   :  { %903 = vadd.xlane.f32.xlu0 %v902_v62 }
 0x588   :  { %1984 = vrot.lane.b32.xlu1 %v2465_v24, %s2230_s15 }
 0x58c   :  { %999 = vrot.lane.b32.xlu1 %v2453_v19, %s2230_s15 }
 0x58e   :  { %1979 = vrot.lane.b32.xlu0 %v2511_v1, %s2229_s6 }
 0x592   :  { %1001 = vrot.lane.b32.xlu0 %v2451_v17, %s2230_s15 }
 0x604   :  { %v907_v63 = vpop.xlane.xlu1 %906 }
 0x605   :  { %2013 = vrcp.f32 %v907_v63  ;;  %v904_v0 = vpop.xlane.xlu0 %903 }
 0x606   :  { %2015 = vrcp.f32 %v904_v0 }
 0x608   :  { %v1985_v2 = vpop.permute.xlu1 %1984 }
 0x609   :  { %v1980_v3 = vpop.permute.xlu0 %1979  ;;  %v1987_v4 = vunpack.i.h.bf16 %v1985_v2  ;;  %v1986_v6 = vunpack.i.l.bf16 %v1985_v2 }
 0x60a   :  { %v1982_v7 = vunpack.i.h.bf16 %v1980_v3  ;;  %v1981_v8 = vunpack.i.l.bf16 %v1980_v3 }
 0x60b   :  { %v1906_v9 = vpack.c.bf16 %v1987_v4, %v1986_v6  ;;  %v1637_v4 = vld [vmem:[#allocation13] ss:$0 sm:$0xff] }
 0x60c   :  { %v1902_v24 = vpack.c.bf16 %v1982_v7, %v1981_v8  ;;  %v1000_v13 = vpop.permute.xlu1 %999 }
 0x60d   :  { %v1002_v14 = vpop.permute.xlu0 %1001 }
 0x60e   :  { %1903 = vmatprep.subr.bf16.mxu1 %v1902_v24 }
 0x60f   :  { %v2014_v19 = vpop.eup %2013  ;;  %1905 = vmatpush3.bf16.msra.mxu1 %v1902_v24 }
 0x610   :  { %v2016_v10 = vpop.eup %2015  ;;  %1908 = vmatprep.subr.msk.bf16.mxu1 %vm2461_vm2, %v1906_v9  ;;  %v911_v11 = vmul.f32 %v2014_v19, %v2010_v59 }
 0x611   :  { %v910_v17 = vmul.f32 %v2016_v10, %v2012_v60 }
 0x613   :  { %1794 = vmatprep.mubr.msk.f32.mxu1 %vm493_vm3, %v910_v17 }
 0x614   :  { %1795 = vmatmul.mubr.msk.f32.vlgmr.msra.gmra.mrb[8].mxu1 %vm493_vm3, %v911_v11 }
 0x615   :  { %1801 = vmatprep.mubr.msk.f32.mxu1 %vm405_vm1, %v1000_v13 }
 0x618   :  { %1911 = vmatpush3.bf16.xpose.msk.msra.mxu1 %vm2461_vm2, %v1906_v9 }
 0x61f   :  { %1802 = vmatmul.mubr.msk.f32.vlgmr.msra.gmra.mrb[10].mxu1 %vm405_vm1, %v1002_v14 }
 0x6e7   :  { %v1796_v15 = vpop.f32.mrb[8].mxu1 }
 0x6e8   :  { %v990_v16 = vpop.f32.mrb[9].mxu1 }
 0x6f2   :  { %v1803_v18 = vpop.f32.mrb[10].mxu1 }
 0x6f3   :  { %v1087_v20 = vadd.f32 %v1803_v18, %v2497_v39  ;;  %v1081_v21 = vpop.f32.mrb[11].mxu1 }
 0x6f4   :  { %v1082_v23 = vadd.f32 %v1081_v21, %v2499_v40  ;;  %v1361_v21 = vld [vmem:[#allocation11 + $0x8] sm:$0xff] }
 0x6f5   :  { %v1093_v25 = vsel %vm493_vm3, %v1087_v20, -inf }
 0x6f6   :  { %1094 = vmax.xlane.f32.xlu0 %v1093_v25  ;;  %v1090_v26 = vsel %vm493_vm3, %v1082_v23, -inf  ;;  %v1362_v25 = vld [vmem:[#allocation11 + $0x10] sm:$0xff] }
 0x6f7   :  { %1091 = vmax.xlane.f32.xlu1 %v1090_v26  ;;  %v1363_v26 = vld [vmem:[#allocation11 + $0x18] sm:$0xff] }
 0x783   :  { %v1095_v27 = vpop.xlane.xlu0 %1094 }
 0x784   :  { %v1097_v22 = vsub.f32 %v1087_v20, %v1095_v27  ;;  %v1092_v28 = vpop.xlane.xlu1 %1091  ;;  %v1928_v27 = vpack.c.bf16 %v1363_v26, %v1362_v25  ;;  %v1648_v25 = vld [vmem:[#allocation13 + $0x5] ss:$0 sm:$0xff] }
 0x785   :  { %v1096_v29 = vsub.f32 %v1082_v23, %v1092_v28  ;;  %v1452_v28 = vld [vmem:[%s2647_s9 + $0x8] sm:$0xff] }
 0x786   :  { %v1100_v30 = vmul.f32 1.442695, %v1097_v22  ;;  %v1451_v22 = vld [vmem:[%s2647_s9] sm:$0xff] }
 0x787   :  { %v1098_v31 = vmul.f32 1.442695, %v1096_v29  ;;  %v1453_v29 = vld [vmem:[%s2647_s9 + $0x10] sm:$0xff] }
 0x788   :  { %2017 = vpow2.f32 %v1100_v30  ;;  %v1932_v30 = vpack.c.bf16 %v1452_v28, %v1451_v22  ;;  %v1649_v28 = vld [vmem:[#allocation13 + $0x6] ss:$0 sm:$0xff] }
 0x789   :  { %2019 = vpow2.f32 %v1098_v31  ;;  %v1454_v31 = vld [vmem:[%s2647_s9 + $0x18] sm:$0xff] }
 0x792   :  { %v2018_v32 = vpop.eup %2017 }
 0x793   :  { %v2020_v33 = vpop.eup %2019  ;;  %v1105_v39 = vsel %vm493_vm3, %v2018_v32, 0.0 }
 0x794   :  { %1106 = vadd.xlane.f32.xlu1 %v1105_v39  ;;  %v1102_v40 = vsel %vm493_vm3, %v2020_v33, 0.0  ;;  %v1456_v39 = vld [vmem:[%s2647_s9 + $0x28] sm:$0xff] }
 0x795   :  { %1103 = vadd.xlane.f32.xlu0 %v1102_v40 }
 0x7a5   :  { %1201 = vrot.lane.b32.xlu1 %v2539_v46, %s2222_s30 }
 0x7a9   :  { %1203 = vrot.lane.b32.xlu1 %v2537_v45, %s2222_s30 }
 0x7ab   :  { %1989 = vrot.lane.b32.xlu0 %v2511_v1, %s2230_s15  ;;  %v1230_v1 = vld [vmem:[#allocation10] sm:$0xff] }
 0x7ac   :  { %v1916_v50 = vpack.c.bf16 %v1231_v48, %v1230_v1 }
 0x7ad   :  { %1211 = vrot.lane.b32.xlu1 %v1796_v15, %s2231_s23 }
 0x7af   :  { %1209 = vrot.lane.b32.xlu0 %v990_v16, %s2231_s23 }
 0x821   :  { %v1107_v34 = vpop.xlane.xlu1 %1106 }
 0x822   :  { %2021 = vrcp.f32 %v1107_v34  ;;  %v1104_v35 = vpop.xlane.xlu0 %1103 }
 0x823   :  { %2023 = vrcp.f32 %v1104_v35 }
 0x825   :  { %v1202_v55 = vpop.permute.xlu1 %1201 }
 0x826   :  { %v1990_v36 = vpop.permute.xlu0 %1989  ;;  %v1223_v59 = vsel %vm405_vm1, %v2535_v44, %v1202_v55 }
 0x827   :  { %v1992_v37 = vunpack.i.h.bf16 %v1990_v36  ;;  %v1991_v38 = vunpack.i.l.bf16 %v1990_v36 }
 0x829   :  { %v1912_v41 = vpack.c.bf16 %v1992_v37, %v1991_v38  ;;  %v1204_v56 = vpop.permute.xlu1 %1203 }
 0x82a   :  { %v1210_v58 = vpop.permute.xlu0 %1209  ;;  %v1224_v61 = vsel %vm405_vm1, %v2533_v43, %v1204_v56  ;;  %v1642_v56 = vld [vmem:[#allocation13 + $0x3] ss:$0 sm:$0xff] }
 0x82b   :  { %1913 = vmatprep.subr.bf16.mxu0 %v1912_v41  ;;  %v1225_v62 = vsel %vm493_vm3, %v1223_v59, %v1210_v58 }
 0x82c   :  { %v2022_v42 = vpop.eup %2021  ;;  %1915 = vmatpush3.bf16.msra.mxu0 %v1912_v41 }
 0x82d   :  { %v2024_v46 = vpop.eup %2023  ;;  %v1111_v45 = vmul.f32 %v2022_v42, %v2018_v32  ;;  %1917 = vmatprep.subr.bf16.mxu0 %v1916_v50  ;;  %v1212_v57 = vpop.permute.xlu1 %1211  ;;  %v1936_v32 = vpack.c.bf16 %v1454_v31, %v1453_v29 }
 0x82e   :  { %v1110_v47 = vmul.f32 %v2024_v46, %v2020_v33  ;;  %v1226_v0 = vsel %vm493_vm3, %v1224_v61, %v1212_v57  ;;  %v1455_v33 = vld [vmem:[%s2647_s9 + $0x20] sm:$0xff] }
 0x82f   :  { %v1940_v40 = vpack.c.bf16 %v1456_v39, %v1455_v33  ;;  %v1640_v46 = vld [vmem:[#allocation13 + $0x1] ss:$0 sm:$0xff] }
 0x830   :  { %1808 = vmatprep.mubr.msk.f32.mxu0 %vm493_vm3, %v1110_v47 }
 0x831   :  { %1809 = vmatmul.mubr.msk.f32.vlgmr.msra.gmra.mrb[8].mxu0 %vm493_vm3, %v1111_v45  ;;  %v1641_v45 = vld [vmem:[#allocation13 + $0x2] ss:$0 sm:$0xff] }
 0x832   :  { %1919 = vmatpush3.bf16.msra.mxu0 %v1916_v50 }
 0x833   :  { %1921 = vmatprep.subr.bf16.mxu0 %v1920_v52 }
 0x836   :  { %1923 = vmatpush3.bf16.msra.mxu0 %v1920_v52 }
 0x837   :  { %1933 = vmatprep.subr.bf16.mxu0 %v1932_v30 }
 0x904   :  { %v1810_v53 = vpop.f32.mrb[8].mxu0 }
 0x905   :  { %1219 = vrot.lane.b32.xlu1 %v1810_v53, %s2232_s1  ;;  %v1190_v54 = vpop.f32.mrb[9].mxu0  ;;  %v1457_v53 = vld [vmem:[%s2647_s9 + $0x30] sm:$0xff] }
 0x906   :  { %1217 = vrot.lane.b32.xlu0 %v1190_v54, %s2232_s1  ;;  %v1458_v54 = vld [vmem:[%s2647_s9 + $0x38] sm:$0xff]  ;;  %s2233_s9 = smov [#allocation14]  }
 0x907   :  { %v1944_v55 = vpack.c.bf16 %v1458_v54, %v1457_v53  ;;  %s1592_s20 = sshll.u32 %s2233_s9, 4  ;;  %s1593_s20 = int_to_ptr.vmem [resolvable:$true] %s1592_s20 }
 0x908   :  { %s2187_s19 = scalar_lea.vmem %s1593_s20, 256  ;;  %p2192_p1 = scmp.lt.s32.totalorder %s1593_s20, %s1593_s20 }
 0x909   :  { %p2188_p0 = scmp.ne.s32.totalorder %s1593_s20, %s2187_s19  ;;  %p2193_p2 = scmp.lt.s32.totalorder %s2187_s19, %s2187_s19 }
 0x90b   :  { %p2194_p3 = por %p2193_p2, %p2192_p1 }
 0x90d   :  { %p2195_p4 = pnand %p2194_p3, %p2188_p0 }
 0x977   :  { %v1220_v60 = vpop.permute.xlu1 %1219 }
 0x978   :  { %v1218_v63 = vpop.permute.xlu0 %1217  ;;  %v1229_v3 = vsel %vm1227_vm4, %v1226_v0, %v1220_v60 }
 0x979   :  { %v1228_v2 = vsel %vm1227_vm4, %v1225_v62, %v1218_v63  ;;  %v1645_v63 = vld [vmem:[#allocation13 + $0x4] ss:$0 sm:$0xff] }
 0x97a   :  { %1819 = vmatprep.mubr.msk.f32.mxu0 %vm151_vm0, %v1228_v2 }
 0x97b   :  { %1820 = vmatmul.mubr.msk.f32.vlgmr.msra.gmra.mrb[10].mxu0 %vm151_vm0, %v1229_v3 }
 0x97c   :  { %1935 = vmatpush3.bf16.msra.mxu0 %v1932_v30 }
 0x97d   :  { %1937 = vmatprep.subr.bf16.mxu0 %v1936_v32 }
 0x980   :  { %1939 = vmatpush3.bf16.msra.mxu0 %v1936_v32 }
 0x981   :  { %1941 = vmatprep.subr.bf16.mxu0 %v1940_v40 }
 0x984   :  { %1943 = vmatpush3.bf16.msra.mxu0 %v1940_v40 }
 0x985   :  { %1945 = vmatprep.subr.bf16.mxu0 %v1944_v55 }
 0x988   :  { %1947 = vmatpush3.bf16.msra.mxu0 %v1944_v55 }
 0xa4e   :  { %v1821_v6 = vpop.f32.mrb[10].mxu0 }
 0xa4f   :  { %v1316_v7 = vadd.f32 %v1821_v6, %v1637_v4  ;;  %v1310_v8 = vpop.f32.mrb[11].mxu0 }
 0xa50   :  { %v1311_v44 = vadd.f32 %v1637_v4, %v1310_v8 }
 0xa51   :  { %v1320_v24 = vadd.f32 %v1316_v7, %v2445_v12 }
 0xa52   :  { %v1319_v43 = vadd.f32 %v1311_v44, %v2429_v5  ;;  %v1360_v5 = vld [vmem:[#allocation11] sm:$0xff] }
 0xa53   :  { %v1324_v9 = vsel %vm151_vm0, %v1320_v24, 0.0  ;;  %v1924_v23 = vpack.c.bf16 %v1361_v21, %v1360_v5 }
 0xa54   :  { %1325 = vadd.xlane.f32.xlu1 %v1324_v9  ;;  %v1321_v19 = vsel %vm151_vm0, %v1319_v43, 0.0 }
 0xa55   :  { %1322 = vadd.xlane.f32.xlu0 %v1321_v19  ;;  %1925 = vmatprep.subr.bf16.mxu1 %v1924_v23 }
 0xa56   :  { %1927 = vmatpush3.bf16.msra.mxu1 %v1924_v23 }
 0xa57   :  { %1929 = vmatprep.subr.bf16.mxu1 %v1928_v27 }
 0xa5a   :  { %1931 = vmatpush3.bf16.msra.mxu1 %v1928_v27 }
 0xae1   :  { %v1326_v10 = vpop.xlane.xlu1 %1325 }
 0xae2   :  { %v1329_v17 = vmul.f32 0.03125, %v1326_v10  ;;  %v1323_v11 = vpop.xlane.xlu0 %1322 }
 0xae3   :  { %v1328_v13 = vmul.f32 0.03125, %v1323_v11 }
 0xae4   :  { %v1331_v14 = vsub.f32 %v1320_v24, %v1329_v17 }
 0xae5   :  { %v1330_v15 = vsub.f32 %v1319_v43, %v1328_v13 }
 0xae6   :  { %v1333_v20 = vmul.f32 %v1331_v14, %v1331_v14 }
 0xae7   :  { %v1332_v16 = vmul.f32 %v1330_v15, %v1330_v15 }
 0xae8   :  { %v1337_v12 = vsel %vm151_vm0, %v1333_v20, 0.0 }
 0xae9   :  { %v1334_v18 = vsel %vm151_vm0, %v1332_v16, 0.0 }
 0xaea   :  { %1335 = vadd.xlane.f32.xlu0 %v1334_v18 }
 0xaee   :  { %1338 = vadd.xlane.f32.xlu0 %v1337_v12 }
 0xb77   :  { %v1336_v34 = vpop.xlane.xlu0 %1335 }
 0xb78   :  { %v1340_v35 = vmul.f32 0.03125, %v1336_v34 }
 0xb7a   :  { %v1342_v36 = vadd.f32 1e-05, %v1340_v35 }
 0xb7b   :  { %v1339_v37 = vpop.xlane.xlu0 %1338 }
 0xb7c   :  { %2025 = vrsqrt.f32 %v1342_v36  ;;  %v1341_v38 = vmul.f32 0.03125, %v1339_v37 }
 0xb7e   :  { %v1343_v41 = vadd.f32 1e-05, %v1341_v38 }
 0xb80   :  { %2027 = vrsqrt.f32 %v1343_v41 }
 0xb86   :  { %v2026_v42 = vpop.eup %2025 }
 0xb87   :  { %v1346_v47 = vmul.f32 %v2026_v42, %v1330_v15 }
 0xb89   :  { %v1352_v1 = vmul.f32 %v1640_v46, %v1346_v47 }
 0xb8a   :  { %v2028_v48 = vpop.eup %2027 }
 0xb8b   :  { %v1347_v49 = vmul.f32 %v2028_v48, %v1331_v14  ;;  %v1358_v50 = vadd.f32 %v1641_v45, %v1352_v1 }
 0xb8d   :  { %v1353_v51 = vmul.f32 %v1640_v46, %v1347_v49  ;;  %1830 = vmatprep.mubr.msk.f32.mxu1 %vm151_vm0, %v1358_v50 }
 0xb8f   :  { %v1359_v52 = vadd.f32 %v1641_v45, %v1353_v51 }
 0xb91   :  { %1831 = vmatmul.mubr.msk.f32.vlgmr.msra.gmra.mrb[12].mxu1 %vm151_vm0, %v1359_v52 }
 0xc64   :  { %v1832_v57 = vpop.f32.mrb[12].mxu1 }
 0xc65   :  { %v1446_v58 = vadd.f32 %v1832_v57, %v1642_v56  ;;  %v1440_v59 = vpop.f32.mrb[13].mxu1 }
 0xc66   :  { %v1441_v60 = vadd.f32 %v1642_v56, %v1440_v59 }
 0xc67   :  { %v1450_v62 = vmax.f32 %v1446_v58, 0.0 }
 0xc68   :  { %v1449_v61 = vmax.f32 %v1441_v60, 0.0 }
 0xc6a   :  { %1849 = vmatprep.mubr.msk.f32.mxu0 %vm1463_vm5, %v1449_v61 }
 0xc6b   :  { %1850 = vmatmul.mubr.msk.f32.vlgmr.msra.gmra.mrb[12].mxu0 %vm1463_vm5, %v1450_v62 }
 0xd3e   :  { %v1851_v0 = vpop.f32.mrb[12].mxu0 }
 0xd3f   :  { %v1542_v2 = vadd.f32 %v1851_v0, %v1645_v63  ;;  %v1536_v3 = vpop.f32.mrb[13].mxu0 }
 0xd40   :  { %v1537_v4 = vadd.f32 %v1645_v63, %v1536_v3 }
 0xd41   :  { %v1546_v6 = vadd.f32 %v1542_v2, %v1359_v52 }
 0xd42   :  { %v1545_v7 = vadd.f32 %v1537_v4, %v1358_v50 }
 0xd43   :  { %v1550_v8 = vsel %vm151_vm0, %v1546_v6, 0.0 }
 0xd44   :  { %1551 = vadd.xlane.f32.xlu0 %v1550_v8  ;;  %v1547_v44 = vsel %vm151_vm0, %v1545_v7, 0.0 }
 0xd45   :  { %1548 = vadd.xlane.f32.xlu1 %v1547_v44 }
 0xdd1   :  { %v1552_v24 = vpop.xlane.xlu0 %1551 }
 0xdd2   :  { %v1554_v43 = vmul.f32 0.03125, %v1552_v24  ;;  %v1549_v9 = vpop.xlane.xlu1 %1548 }
 0xdd3   :  { %v1553_v19 = vmul.f32 0.03125, %v1549_v9 }
 0xdd4   :  { %v1556_v10 = vsub.f32 %v1546_v6, %v1554_v43 }
 0xdd5   :  { %v1555_v17 = vsub.f32 %v1545_v7, %v1553_v19 }
 0xdd6   :  { %v1558_v11 = vmul.f32 %v1556_v10, %v1556_v10 }
 0xdd7   :  { %v1557_v13 = vmul.f32 %v1555_v17, %v1555_v17 }
 0xdd8   :  { %v1562_v14 = vsel %vm151_vm0, %v1558_v11, 0.0 }
 0xdd9   :  { %1563 = vadd.xlane.f32.xlu0 %v1562_v14  ;;  %v1559_v15 = vsel %vm151_vm0, %v1557_v13, 0.0 }
 0xdda   :  { %1560 = vadd.xlane.f32.xlu1 %v1559_v15 }
 0xe66   :  { %v1564_v16 = vpop.xlane.xlu0 %1563 }
 0xe67   :  { %v1566_v18 = vmul.f32 0.03125, %v1564_v16  ;;  %v1561_v20 = vpop.xlane.xlu1 %1560 }
 0xe68   :  { %v1565_v12 = vmul.f32 0.03125, %v1561_v20 }
 0xe69   :  { %v1568_v5 = vadd.f32 1e-05, %v1566_v18 }
 0xe6a   :  { %v1567_v21 = vadd.f32 1e-05, %v1565_v12 }
 0xe6b   :  { %2029 = vrsqrt.f32 %v1568_v5 }
 0xe6c   :  { %2031 = vrsqrt.f32 %v1567_v21 }
 0xe75   :  { %v2030_v23 = vpop.eup %2029 }
 0xe76   :  { %v2032_v26 = vpop.eup %2031  ;;  %v1572_v27 = vmul.f32 %v2030_v23, %v1556_v10 }
 0xe77   :  { %v1571_v22 = vmul.f32 %v2032_v26, %v1555_v17 }
 0xe78   :  { %v1578_v29 = vmul.f32 %v1648_v25, %v1572_v27 }
 0xe79   :  { %v1577_v30 = vmul.f32 %v1648_v25, %v1571_v22 }
 0xe7a   :  { %v1584_v31 = vadd.f32 %v1649_v28, %v1578_v29 }
 0xe7b   :  { %v1583_v32 = vadd.f32 %v1649_v28, %v1577_v30 }
 0xe7c   :  { %1586 = vst.msk [vmem:[#allocation14 + $0x8] sm:$0xff] %vm151_vm0, %v1584_v31 }
 0xe7d   :  { %1585 = vst.msk [vmem:[#allocation14] sm:$0xff] %vm151_vm0, %v1583_v32 }
 0xe7e   :  { %2198 = shalt.err (!%p2195_p4)
}
 0xe7f   :  { %s2199_s0 = scalar_lea.hbm %s2649_s11, 256 }
 0xe80   :  { %p2200_p5 = scmp.ne.s32.totalorder %s2649_s11, %s2199_s0  ;;  %p2203_p6 = scmp.lt.u32.totalorder %s2199_s0, %s2649_s11 }
 0xe82   :  { %p2205_p7 = pnand %p2203_p6, %p2200_p5 }
 0xe84   :  { %2208 = shalt.err (!%p2205_p7)
}
 0xe85   :  { %1598 = dma.vmem_to_hbm [thread:$0]  %s1593_s20, 256, %s2649_s11, [#allocation4], %s2221_s29, %s2221_s29, %s2222_s30  }
 0xe86   :  { %2217 = dma.done.wait [#allocation4], 256  }
 0xe87   :  { %2218 = vsyncadd [#allocation4], 4294967040 }
 0xe88   :  { %1602 = vsyncpa [#allocation3], 1 }
 0xe89   :  { %1603 = vsyncpa [#allocation6], 1 }
 0xe8a   :  { %1604 = vsyncpa [#allocation9], 1 }
 0xe8b   :  { %1605 = vsyncpa [#allocation12], 1 }
 0xe8c   :  { %1606 = vsyncpa [#allocation4], 1 }

</bundles_post_ra>
